<compile_context>
chip_gen: v7x
topology: tpu7x:2x2x1
jax: 0.10.0
libtpu: 0.0.40
codegen_flags: <defaults>
</compile_context>

<pallas_src>
import functools
import math

import jax
import jax.numpy as jnp
from jax.experimental import pallas as pl
from jax.experimental.pallas import tpu as pltpu


def _round_up(n: int, m: int) -> int:
    return ((n + m - 1) // m) * m


# ------------------------------ Pallas kernel --------------------------------
def _supcon_fused_kernel(*refs, num_layers, relu_flags, num_feat_layers,
                         compute_dtype):
    """Fused MLP feature extractor + projection head + L2 normalize (one M-tile).

    refs = (x, w0, b0, ..., w_{L-1}, b_{L-1}, feat_out, proj_out)
      x        : (TM, K0p)   bf16, zero-padded batch / features (current tile)
      w_i      : (K_ip, N_ip) compute_dtype (bf16), zero-padded, VMEM-resident
      b_i      : (1, N_ip)   f32, zero-padded
      feat_out : (TM, Fp)    bf16 -- feature-extractor output (last_features)
      proj_out : (TM, Pp)    f32  -- L2-normalized projection embedding
    """
    x_ref = refs[0]
    feat_out_ref = refs[1 + 2 * num_layers]
    proj_out_ref = refs[2 + 2 * num_layers]

    h = x_ref[...]  # bf16 tile; feeds MXU directly for layer 0
    for li in range(num_layers):
        w_ref = refs[1 + 2 * li]
        b_ref = refs[2 + 2 * li]
        lhs = h if h.dtype == compute_dtype else h.astype(compute_dtype)
        # bf16 MXU matmul with f32 accumulation; bias/ReLU in f32.
        y = jnp.dot(lhs, w_ref[...], preferred_element_type=jnp.float32)
        y = y + b_ref[...]
        if relu_flags[li]:
            y = jnp.maximum(y, 0.0)
        h = y
        if li == num_feat_layers - 1:
            # feat = feature_extractor(x)  (kept for self.last_features)
            feat_out_ref[...] = h.astype(feat_out_ref.dtype)

    # F.normalize(h, dim=1): x / max(||x||_2, eps)  ==  x * rsqrt(max(ss, eps^2)).
    # Padded columns are zero, so they do not perturb the norm.  rsqrt goes to
    # the EUP (its own VLIW slot) and avoids a full-width VPU divide.
    ss = jnp.sum(h * h, axis=-1, keepdims=True)
    inv = jax.lax.rsqrt(jnp.maximum(ss, 1e-24))
    proj_out_ref[...] = (h * inv).astype(proj_out_ref.dtype)


# ------------------------------- parameters ----------------------------------
def _init_linear_params(key, fan_in, fan_out):
    """nn.Linear-style init (uniform +-1/sqrt(fan_in)); stored as (in, out)."""
    kw, kb = jax.random.split(key)
    bound = 1.0 / math.sqrt(fan_in)
    w = jax.random.uniform(kw, (fan_in, fan_out), jnp.float32,
                           minval=-bound, maxval=bound)
    b = jax.random.uniform(kb, (fan_out,), jnp.float32,
                           minval=-bound, maxval=bound)
    return w, b


# ------------------------------ SupCon model ---------------------------------
class SupConModelPallas:
    """SupConModel forward (projection-head path) as a single fused kernel.

    feature_extractor := MLP(Linear+ReLU per layer), projection_head :=
    Linear -> ReLU -> Linear, output := F.normalize(projection, dim=1).
    """
    # TODO(synk): the classifier branch (use_projection_head(False) ->
    # forward_classifier) is not implemented -- the classifier submodule is
    # unspecified in the reference; the default forward path is implemented.

    def __init__(self, input_size=28 * 28, feat_hidden_sizes=(256, 256),
                 projection_dim=128, projection_hidden_dim=None,
                 param_dtype=jnp.bfloat16, batch_tile=256, key=None):
        self.input_size = int(input_size)
        self.feat_hidden_sizes = tuple(int(s) for s in feat_hidden_sizes)
        self.features_dim = self.feat_hidden_sizes[-1]
        self.projection_dim = int(projection_dim)
        if projection_hidden_dim is None:
            projection_hidden_dim = self.features_dim  # SupConModel default
        self.projection_hidden_dim = int(projection_hidden_dim)
        self.param_dtype = param_dtype
        # MXU-native M tile: 256 on v6e/v7x (2x256^2 MXU), 128 on v5e.
        self.batch_tile = int(batch_tile)
        self.last_features = None

        # Layer sizes: feature-extractor MLP then projection head.
        sizes = ([self.input_size] + list(self.feat_hidden_sizes)
                 + [self.projection_hidden_dim, self.projection_dim])
        self.num_feat_layers = len(self.feat_hidden_sizes)
        self.num_layers = len(sizes) - 1
        # ReLU after every feature layer and after the first projection layer;
        # the projection output layer is linear (then normalized).
        self.relu_flags = tuple([True] * self.num_feat_layers + [True, False])

        if key is None:
            key = jax.random.PRNGKey(42)

        self.raw_params = []      # unpadded f32 (for the reference check)
        self.padded_params = []   # lane-padded, weights cast to param_dtype
        self.padded_sizes = [_round_up(s, 128) for s in sizes]
        for li in range(self.num_layers):
            key, sub = jax.random.split(key)
            w, b = _init_linear_params(sub, sizes[li], sizes[li + 1])
            self.raw_params.append((w, b))
            kp, np_ = self.padded_sizes[li], self.padded_sizes[li + 1]
            wp = jnp.zeros((kp, np_), param_dtype)
            wp = wp.at[:sizes[li], :sizes[li + 1]].set(w.astype(param_dtype))
            bp = jnp.zeros((1, np_), jnp.float32).at[0, :sizes[li + 1]].set(b)
            self.padded_params.append((wp, bp))

    def __call__(self, x):
        # Flatten NCHW -> (B, input_size).  `.squeeze()` in the reference is a
        # no-op for 2-D (B, D) features with B > 1, so features stay 2-D here.
        B = x.shape[0]
        # Cast to bf16 BEFORE padding: halves the largest HBM read and the pad
        # buffer; the MXU consumes bf16 anyway.
        x2d = x.reshape(B, self.input_size).astype(self.param_dtype)

        K0p = self.padded_sizes[0]
        feat_pad = self.padded_sizes[self.num_feat_layers]
        proj_pad = self.padded_sizes[-1]

        # Batch tiling: MXU-native TM tiles for big batches (double-buffered,
        # megacore-shardable), a single 16-row-aligned tile for small batches.
        if B > self.batch_tile:
            TM = self.batch_tile
            Mp = _round_up(B, TM)
        else:
            Mp = _round_up(max(B, 16), 16)
            TM = Mp
        num_tiles = Mp // TM

        xp = jnp.pad(x2d, ((0, Mp - B), (0, K0p - self.input_size)))

        # Advisory cost estimate for XLA scheduling.
        flops = 0
        bytes_accessed = xp.size * xp.dtype.itemsize
        weight_bytes = 0
        for wp, bp in self.padded_params:
            flops += 2 * Mp * wp.shape[0] * wp.shape[1]
            weight_bytes += wp.size * wp.dtype.itemsize + bp.size * 4
        bytes_accessed += weight_bytes + Mp * (feat_pad * 2 + proj_pad * 4)

        # Explicit VMEM budget: resident weights + double-buffered x/feat/proj
        # tiles + f32 activation working set + headroom.  Capped below v7x's
        # 64 MiB physical VMEM.
        tile_io_bytes = (TM * K0p * 2) + (TM * feat_pad * 2) + (TM * proj_pad * 4)
        act_bytes = 2 * TM * max(self.padded_sizes) * 4
        vmem_limit = weight_bytes + 2 * tile_io_bytes + act_bytes + (8 << 20)
        vmem_limit = int(min(vmem_limit, 60 << 20))

        kernel = functools.partial(
            _supcon_fused_kernel,
            num_layers=self.num_layers,
            relu_flags=self.relu_flags,
            num_feat_layers=self.num_feat_layers,
            compute_dtype=self.param_dtype,
        )

        # Batch-tiled I/O; weights/biases get a constant index_map so they are
        # DMA'd once and stay VMEM-resident across the whole grid.
        x_spec = pl.BlockSpec((TM, K0p), lambda i: (i, 0))
        param_specs = []
        for wp, bp in self.padded_params:
            param_specs.append(pl.BlockSpec(wp.shape, lambda i: (0, 0)))
            param_specs.append(pl.BlockSpec(bp.shape, lambda i: (0, 0)))
        feat_spec = pl.BlockSpec((TM, feat_pad), lambda i: (i, 0))
        proj_spec = pl.BlockSpec((TM, proj_pad), lambda i: (i, 0))

        feat_padded, proj_padded = pl.pallas_call(
            kernel,
            out_shape=(
                jax.ShapeDtypeStruct((Mp, feat_pad), self.param_dtype),
                jax.ShapeDtypeStruct((Mp, proj_pad), jnp.float32),
            ),
            grid=(num_tiles,),
            in_specs=[x_spec] + param_specs,
            out_specs=(feat_spec, proj_spec),
            compiler_params=pltpu.CompilerParams(
                dimension_semantics=("parallel",),
                vmem_limit_bytes=vmem_limit),
            cost_estimate=pl.CostEstimate(
                flops=int(flops),
                transcendentals=int(Mp),
                bytes_accessed=int(bytes_accessed)),
        )(xp, *[t for wb in self.padded_params for t in wb])

        # self.last_features = feat (detach is implicit: JAX arrays are values).
        # Padded rows B..Mp-1 are garbage and are sliced off here.
        self.last_features = feat_padded[:B, :self.features_dim].astype(jnp.float32)
        return proj_padded[:B, :self.projection_dim]


# -------------------------------- demo / test ---------------------------------
if __name__ == "__main__":
    B, C, H, W = 4, 1, 28, 28
    x = jax.random.normal(jax.random.PRNGKey(0), (B, C, H, W), dtype=jnp.float32)

    model = SupConModelPallas(
        input_size=C * H * W,
        feat_hidden_sizes=(256, 256),   # MLP feature extractor, features_dim=256
        projection_dim=128,
        projection_hidden_dim=None,     # defaults to features_dim (as in SupConModel)
        param_dtype=jnp.bfloat16,
        key=jax.random.PRNGKey(1),
    )

    out = jax.block_until_ready(model(x))

    # Pure-JAX reference mirroring the kernel math (bf16 matmul inputs, f32 accum).
    h = x.reshape(B, -1).astype(model.param_dtype)
    feat_ref = None
    for li, ((w, b), rf) in enumerate(zip(model.raw_params, model.relu_flags)):
        y = jnp.dot(h.astype(model.param_dtype), w.astype(model.param_dtype),
                    preferred_element_type=jnp.float32) + b
        if rf:
            y = jnp.maximum(y, 0.0)
        h = y
        if li == model.num_feat_layers - 1:
            feat_ref = h
    norm = jnp.maximum(jnp.sqrt(jnp.sum(h * h, axis=-1, keepdims=True)), 1e-12)
    ref = h / norm

    assert out.shape == (B, model.projection_dim), out.shape
    assert model.last_features.shape == (B, model.features_dim)
    assert jnp.allclose(out, ref, atol=2e-3, rtol=2e-3), \
        float(jnp.max(jnp.abs(out - ref)))
    # last_features is stored via bf16 -> looser tolerance.
    assert jnp.allclose(model.last_features, feat_ref, atol=5e-2, rtol=5e-2)

    print("KERNEL_OK")
</pallas_src>

<mosaic_0001>
module attributes {stable_mosaic.version = 11 : i64} {
  func.func @_supcon_fused_kernel(%arg0: i32, %arg1: memref<16x896xbf16, #tpu.memory_space<vmem>>, %arg2: memref<896x256xbf16, #tpu.memory_space<vmem>>, %arg3: memref<1x256xf32, #tpu.memory_space<vmem>>, %arg4: memref<256x256xbf16, #tpu.memory_space<vmem>>, %arg5: memref<1x256xf32, #tpu.memory_space<vmem>>, %arg6: memref<256x256xbf16, #tpu.memory_space<vmem>>, %arg7: memref<1x256xf32, #tpu.memory_space<vmem>>, %arg8: memref<256x128xbf16, #tpu.memory_space<vmem>>, %arg9: memref<1x128xf32, #tpu.memory_space<vmem>>, %arg10: memref<16x256xbf16, #tpu.memory_space<vmem>>, %arg11: memref<16x128xf32, #tpu.memory_space<vmem>>) attributes {dimension_semantics = [#tpu.dimension_semantics<parallel>], iteration_bounds = array<i64: 1>, scalar_prefetch = 0 : i64, scratch_operands = 0 : i64, tpu.core_type = #tpu.core_type<tc>, window_params = [{transform_indices = @transform_0, window_bounds = array<i64: 16, 896>}, {pipeline_mode = #tpu.pipeline_mode<synchronous>, transform_indices = @transform_1, window_bounds = array<i64: 896, 256>}, {pipeline_mode = #tpu.pipeline_mode<synchronous>, transform_indices = @transform_2, window_bounds = array<i64: 1, 256>}, {pipeline_mode = #tpu.pipeline_mode<synchronous>, transform_indices = @transform_3, window_bounds = array<i64: 256, 256>}, {pipeline_mode = #tpu.pipeline_mode<synchronous>, transform_indices = @transform_4, window_bounds = array<i64: 1, 256>}, {pipeline_mode = #tpu.pipeline_mode<synchronous>, transform_indices = @transform_5, window_bounds = array<i64: 256, 256>}, {pipeline_mode = #tpu.pipeline_mode<synchronous>, transform_indices = @transform_6, window_bounds = array<i64: 1, 256>}, {pipeline_mode = #tpu.pipeline_mode<synchronous>, transform_indices = @transform_7, window_bounds = array<i64: 256, 128>}, {pipeline_mode = #tpu.pipeline_mode<synchronous>, transform_indices = @transform_8, window_bounds = array<i64: 1, 128>}, {transform_indices = @transform_9, window_bounds = array<i64: 16, 256>}, {transform_indices = @transform_10, window_bounds = array<i64: 16, 128>}]} {
    %c0 = arith.constant 0 : index
    %c0_0 = arith.constant 0 : index
    %0 = vector.load %arg1[%c0, %c0_0] : memref<16x896xbf16, #tpu.memory_space<vmem>>, vector<16x896xbf16>
    %c0_1 = arith.constant 0 : index
    %c0_2 = arith.constant 0 : index
    %1 = vector.load %arg2[%c0_1, %c0_2] : memref<896x256xbf16, #tpu.memory_space<vmem>>, vector<896x256xbf16>
    %cst = arith.constant dense<0.000000e+00> : vector<16x256xf32>
    %2 = tpu.matmul %0, %1, %cst {dimension_numbers = #tpu.dot_dimension_numbers<[1], [0], [0], [1], [0, 0, 1, 1], [], []>} : vector<16x896xbf16>, vector<896x256xbf16>, vector<16x256xf32> -> vector<16x256xf32>
    %c0_3 = arith.constant 0 : index
    %c0_4 = arith.constant 0 : index
    %3 = vector.load %arg3[%c0_3, %c0_4] : memref<1x256xf32, #tpu.memory_space<vmem>>, vector<1x256xf32>
    %4 = vector.broadcast %3 : vector<1x256xf32> to vector<16x256xf32>
    %5 = arith.addf %2, %4 : vector<16x256xf32>
    %cst_5 = arith.constant 0.000000e+00 : f32
    %6 = vector.broadcast %cst_5 : f32 to vector<16x256xf32>
    %7 = arith.maximumf %5, %6 : vector<16x256xf32>
    %8 = arith.truncf %7 : vector<16x256xf32> to vector<16x256xbf16>
    %c0_6 = arith.constant 0 : index
    %c0_7 = arith.constant 0 : index
    %9 = vector.load %arg4[%c0_6, %c0_7] : memref<256x256xbf16, #tpu.memory_space<vmem>>, vector<256x256xbf16>
    %cst_8 = arith.constant dense<0.000000e+00> : vector<16x256xf32>
    %10 = tpu.matmul %8, %9, %cst_8 {dimension_numbers = #tpu.dot_dimension_numbers<[1], [0], [0], [1], [0, 0, 1, 1], [], []>} : vector<16x256xbf16>, vector<256x256xbf16>, vector<16x256xf32> -> vector<16x256xf32>
    %c0_9 = arith.constant 0 : index
    %c0_10 = arith.constant 0 : index
    %11 = vector.load %arg5[%c0_9, %c0_10] : memref<1x256xf32, #tpu.memory_space<vmem>>, vector<1x256xf32>
    %12 = vector.broadcast %11 : vector<1x256xf32> to vector<16x256xf32>
    %13 = arith.addf %10, %12 : vector<16x256xf32>
    %cst_11 = arith.constant 0.000000e+00 : f32
    %14 = vector.broadcast %cst_11 : f32 to vector<16x256xf32>
    %15 = arith.maximumf %13, %14 : vector<16x256xf32>
    %16 = arith.truncf %15 : vector<16x256xf32> to vector<16x256xbf16>
    %c0_12 = arith.constant 0 : index
    %c0_13 = arith.constant 0 : index
    %17 = vector.load %arg10[%c0_12, %c0_13] : memref<16x256xbf16, #tpu.memory_space<vmem>>, vector<16x256xbf16>
    tpu.vector_store %arg10[%c0_12, %c0_13], %16 {strides = array<i32>} : memref<16x256xbf16, #tpu.memory_space<vmem>>, vector<16x256xbf16>,
    %18 = arith.truncf %15 : vector<16x256xf32> to vector<16x256xbf16>
    %c0_14 = arith.constant 0 : index
    %c0_15 = arith.constant 0 : index
    %19 = vector.load %arg6[%c0_14, %c0_15] : memref<256x256xbf16, #tpu.memory_space<vmem>>, vector<256x256xbf16>
    %cst_16 = arith.constant dense<0.000000e+00> : vector<16x256xf32>
    %20 = tpu.matmul %18, %19, %cst_16 {dimension_numbers = #tpu.dot_dimension_numbers<[1], [0], [0], [1], [0, 0, 1, 1], [], []>} : vector<16x256xbf16>, vector<256x256xbf16>, vector<16x256xf32> -> vector<16x256xf32>
    %c0_17 = arith.constant 0 : index
    %c0_18 = arith.constant 0 : index
    %21 = vector.load %arg7[%c0_17, %c0_18] : memref<1x256xf32, #tpu.memory_space<vmem>>, vector<1x256xf32>
    %22 = vector.broadcast %21 : vector<1x256xf32> to vector<16x256xf32>
    %23 = arith.addf %20, %22 : vector<16x256xf32>
    %cst_19 = arith.constant 0.000000e+00 : f32
    %24 = vector.broadcast %cst_19 : f32 to vector<16x256xf32>
    %25 = arith.maximumf %23, %24 : vector<16x256xf32>
    %26 = arith.truncf %25 : vector<16x256xf32> to vector<16x256xbf16>
    %c0_20 = arith.constant 0 : index
    %c0_21 = arith.constant 0 : index
    %27 = vector.load %arg8[%c0_20, %c0_21] : memref<256x128xbf16, #tpu.memory_space<vmem>>, vector<256x128xbf16>
    %cst_22 = arith.constant dense<0.000000e+00> : vector<16x128xf32>
    %28 = tpu.matmul %26, %27, %cst_22 {dimension_numbers = #tpu.dot_dimension_numbers<[1], [0], [0], [1], [0, 0, 1, 1], [], []>} : vector<16x256xbf16>, vector<256x128xbf16>, vector<16x128xf32> -> vector<16x128xf32>
    %c0_23 = arith.constant 0 : index
    %c0_24 = arith.constant 0 : index
    %29 = vector.load %arg9[%c0_23, %c0_24] : memref<1x128xf32, #tpu.memory_space<vmem>>, vector<1x128xf32>
    %30 = vector.broadcast %29 : vector<1x128xf32> to vector<16x128xf32>
    %31 = arith.addf %28, %30 : vector<16x128xf32>
    %32 = arith.mulf %31, %31 : vector<16x128xf32>
    %cst_25 = arith.constant dense<0.000000e+00> : vector<16xf32>
    %33 = vector.multi_reduction <add>, %32, %cst_25 [1] : vector<16x128xf32> to vector<16xf32>
    %34 = vector.shape_cast %33 : vector<16xf32> to vector<16x1xf32>
    %cst_26 = arith.constant 1.000000e-24 : f32
    %35 = vector.broadcast %cst_26 : f32 to vector<16x1xf32>
    %36 = arith.maximumf %34, %35 : vector<16x1xf32>
    %37 = math.rsqrt %36 : vector<16x1xf32>
    %38 = vector.broadcast %37 : vector<16x1xf32> to vector<16x128xf32>
    %39 = arith.mulf %31, %38 : vector<16x128xf32>
    %c0_27 = arith.constant 0 : index
    %c0_28 = arith.constant 0 : index
    %40 = vector.load %arg11[%c0_27, %c0_28] : memref<16x128xf32, #tpu.memory_space<vmem>>, vector<16x128xf32>
    tpu.vector_store %arg11[%c0_27, %c0_28], %39 {strides = array<i32>} : memref<16x128xf32, #tpu.memory_space<vmem>>, vector<16x128xf32>,
    return
  }
  func.func @transform_0(%arg0: i32) -> (i32, i32) {
    %c0_i32 = arith.constant 0 : i32
    %c0_i32_0 = arith.constant 0 : i32
    return %arg0, %c0_i32 : i32, i32
  }
  func.func @transform_1(%arg0: i32) -> (i32, i32) {
    %c0_i32 = arith.constant 0 : i32
    %c0_i32_0 = arith.constant 0 : i32
    %c0_i32_1 = arith.constant 0 : i32
    return %c0_i32, %c0_i32_0 : i32, i32
  }
  func.func @transform_2(%arg0: i32) -> (i32, i32) {
    %c0_i32 = arith.constant 0 : i32
    %c0_i32_0 = arith.constant 0 : i32
    %c0_i32_1 = arith.constant 0 : i32
    return %c0_i32, %c0_i32_0 : i32, i32
  }
  func.func @transform_3(%arg0: i32) -> (i32, i32) {
    %c0_i32 = arith.constant 0 : i32
    %c0_i32_0 = arith.constant 0 : i32
    %c0_i32_1 = arith.constant 0 : i32
    return %c0_i32, %c0_i32_0 : i32, i32
  }
  func.func @transform_4(%arg0: i32) -> (i32, i32) {
    %c0_i32 = arith.constant 0 : i32
    %c0_i32_0 = arith.constant 0 : i32
    %c0_i32_1 = arith.constant 0 : i32
    return %c0_i32, %c0_i32_0 : i32, i32
  }
  func.func @transform_5(%arg0: i32) -> (i32, i32) {
    %c0_i32 = arith.constant 0 : i32
    %c0_i32_0 = arith.constant 0 : i32
    %c0_i32_1 = arith.constant 0 : i32
    return %c0_i32, %c0_i32_0 : i32, i32
  }
  func.func @transform_6(%arg0: i32) -> (i32, i32) {
    %c0_i32 = arith.constant 0 : i32
    %c0_i32_0 = arith.constant 0 : i32
    %c0_i32_1 = arith.constant 0 : i32
    return %c0_i32, %c0_i32_0 : i32, i32
  }
  func.func @transform_7(%arg0: i32) -> (i32, i32) {
    %c0_i32 = arith.constant 0 : i32
    %c0_i32_0 = arith.constant 0 : i32
    %c0_i32_1 = arith.constant 0 : i32
    return %c0_i32, %c0_i32_0 : i32, i32
  }
  func.func @transform_8(%arg0: i32) -> (i32, i32) {
    %c0_i32 = arith.constant 0 : i32
    %c0_i32_0 = arith.constant 0 : i32
    %c0_i32_1 = arith.constant 0 : i32
    return %c0_i32, %c0_i32_0 : i32, i32
  }
  func.func @transform_9(%arg0: i32) -> (i32, i32) {
    %c0_i32 = arith.constant 0 : i32
    %c0_i32_0 = arith.constant 0 : i32
    return %arg0, %c0_i32 : i32, i32
  }
  func.func @transform_10(%arg0: i32) -> (i32, i32) {
    %c0_i32 = arith.constant 0 : i32
    %c0_i32_0 = arith.constant 0 : i32
    return %arg0, %c0_i32 : i32, i32
  }
}

</mosaic_0001>

<bundles_post_ra>
// kernel: tpu_custom_call.1
= control target key start
LH: loop header
LB: loop body
LE: loop exit
PB: predicated region body
PF: predicated region fallthrough
CT: control target
= control target key end

     0   :  { %16 = vsyncpa [#allocation3], 0  ;;  %s2658_s0 = inlined_call_operand.hbm [shape: bf16[16,896], index: 0, kind: input, shape index: {}]   ;;  %s2659_s1 = inlined_call_operand.hbm [shape: bf16[896,256], index: 1, kind: input, shape index: {}]   ;;  %s2660_s2 = inlined_call_operand.vmem [shape: f32[1,256], index: 2, kind: input, shape index: {}]   ;;  %s2661_s3 = inlined_call_operand.hbm [shape: bf16[256,256], index: 3, kind: input, shape index: {}]   ;;  %s2662_s4 = inlined_call_operand.vmem [shape: f32[1,256], index: 4, kind: input, shape index: {}]   ;;  %s2663_s5 = inlined_call_operand.hbm [shape: bf16[256,256], index: 5, kind: input, shape index: {}]   ;;  %s2664_s6 = inlined_call_operand.vmem [shape: f32[1,256], index: 6, kind: input, shape index: {}]   ;;  %s2665_s7 = inlined_call_operand.hbm [shape: bf16[256,128], index: 7, kind: input, shape index: {}]   ;;  %s2666_s8 = inlined_call_operand.vmem [shape: f32[1,128], index: 8, kind: input, shape index: {}]   ;;  %s2667_s9 = inlined_call_operand.hbm [shape: bf16[16,256], index: 9, kind: output, shape index: {0}]   ;;  %s2668_s10 = inlined_call_operand.hbm [shape: f32[16,128], index: 10, kind: output, shape index: {1}]  }
   0x1   :  { %17 = vsyncpa [#allocation6], 0 }
   0x2   :  { %18 = vsyncpa [#allocation9], 0 }
   0x3   :  { %19 = vsyncpa [#allocation4], 0 }
   0x4   :  { %20 = vsyncpa [#allocation13], 0  ;;  %s2468_s13 = smov [#allocation5]   ;;  %s2304_s17 = scalar_lea.hbm %s2659_s1, 14336 }
   0x5   :  { %s38_s14 = sshll.u32 %s2468_s13, 4  ;;  %p2305_p0 = scmp.ne.s32.totalorder %s2659_s1, %s2304_s17  ;;  %s39_s14 = int_to_ptr.vmem [resolvable:$true] %s38_s14 }
   0x6   :  { %p2308_p1 = scmp.lt.u32.totalorder %s2304_s17, %s2659_s1 }
   0x8   :  { %p2310_p2 = pnand %p2308_p1, %p2305_p0 }
   0xa   :  { %2313 = shalt.err (!%p2310_p2)
}
   0xb   :  { %s2314_s22 = scalar_lea.vmem %s39_s14, 14336  ;;  %p2319_p4 = scmp.lt.s32.totalorder %s39_s14, %s39_s14 }
   0xc   :  { %p2315_p3 = scmp.ne.s32.totalorder %s39_s14, %s2314_s22  ;;  %p2320_p5 = scmp.lt.s32.totalorder %s2314_s22, %s2314_s22 }
   0xe   :  { %p2321_p6 = por %p2320_p5, %p2319_p4 }
  0x10   :  { %p2322_p7 = pnand %p2321_p6, %p2315_p3 }
  0x12   :  { %2325 = shalt.err (!%p2322_p7)
}
  0x13   :  { %s2469_s23 = smov 128   ;;  %s2470_s24 = smov 8  }
  0x14   :  { %44 = dma.hbm_to_vmem [thread:$0]  %s2659_s1, 14336, %s39_s14, [#allocation6], %s2469_s23, %s2469_s23, %s2470_s24  }
  0x15   :  { %s2471_s27 = smov [#allocation8]   ;;  %s2472_s29 = smov [#allocation2]  }
  0x16   :  { %s66_s28 = sshll.u32 %s2471_s27, 4  ;;  %s26_s30 = sshll.u32 %s2472_s29, 4  ;;  %s67_s28 = int_to_ptr.vmem [resolvable:$true] %s66_s28  ;;  %s27_s30 = int_to_ptr.vmem [resolvable:$true] %s26_s30 }
  0x17   :  { %s2326_s13 = scalar_lea.hbm %s2663_s5, 4096 }
  0x18   :  { %p2327_p8 = scmp.ne.s32.totalorder %s2663_s5, %s2326_s13  ;;  %p2330_p9 = scmp.lt.u32.totalorder %s2326_s13, %s2663_s5 }
  0x1a   :  { %p2332_p10 = pnand %p2330_p9, %p2327_p8 }
  0x1c   :  { %2335 = shalt.err (!%p2332_p10)
}
  0x1d   :  { %s2336_s1 = scalar_lea.vmem %s67_s28, 4096  ;;  %p2341_p12 = scmp.lt.s32.totalorder %s67_s28, %s67_s28 }
  0x1e   :  { %p2337_p11 = scmp.ne.s32.totalorder %s67_s28, %s2336_s1  ;;  %p2342_p13 = scmp.lt.s32.totalorder %s2336_s1, %s2336_s1 }
  0x20   :  { %p2343_p0 = por %p2342_p13, %p2341_p12 }
  0x22   :  { %p2344_p1 = pnand %p2343_p0, %p2337_p11 }
  0x24   :  { %2347 = shalt.err (!%p2344_p1)
}
  0x25   :  { %72 = dma.hbm_to_vmem [thread:$0]  %s2663_s5, 4096, %s67_s28, [#allocation9], %s2469_s23, %s2469_s23, %s2470_s24  }
  0x26   :  { %s2348_s22 = scalar_lea.hbm %s2658_s0, 896 }
  0x27   :  { %p2349_p2 = scmp.ne.s32.totalorder %s2658_s0, %s2348_s22  ;;  %p2352_p3 = scmp.lt.u32.totalorder %s2348_s22, %s2658_s0 }
  0x29   :  { %p2354_p4 = pnand %p2352_p3, %p2349_p2 }
  0x2b   :  { %2357 = shalt.err (!%p2354_p4)
}
  0x2c   :  { %s2358_s11 = scalar_lea.vmem %s27_s30, 896  ;;  %p2363_p6 = scmp.lt.s32.totalorder %s27_s30, %s27_s30 }
  0x2d   :  { %p2359_p5 = scmp.ne.s32.totalorder %s27_s30, %s2358_s11  ;;  %p2364_p7 = scmp.lt.s32.totalorder %s2358_s11, %s2358_s11 }
  0x2f   :  { %p2365_p8 = por %p2364_p7, %p2363_p6 }
  0x31   :  { %p2366_p9 = pnand %p2365_p8, %p2359_p5 }
  0x33   :  { %2369 = shalt.err (!%p2366_p9)
}
  0x34   :  { %s2473_s5 = smov 448   ;;  %s2474_s28 = smov 28  }
  0x35   :  { %32 = dma.hbm_to_vmem [thread:$0]  %s2658_s0, 896, %s27_s30, [#allocation3], %s2473_s5, %s2473_s5, %s2474_s28  }
  0x36   :  { %s2475_s15 = smov [#allocation7]   ;;  %s2476_s17 = smov [#allocation10]  }
  0x37   :  { %s52_s16 = sshll.u32 %s2475_s15, 4  ;;  %s80_s18 = sshll.u32 %s2476_s17, 4  ;;  %s53_s16 = int_to_ptr.vmem [resolvable:$true] %s52_s16  ;;  %s81_s18 = int_to_ptr.vmem [resolvable:$true] %s80_s18 }
  0x38   :  { %s2370_s19 = scalar_lea.hbm %s2661_s3, 4096 }
  0x39   :  { %p2371_p10 = scmp.ne.s32.totalorder %s2661_s3, %s2370_s19  ;;  %p2374_p11 = scmp.lt.u32.totalorder %s2370_s19, %s2661_s3 }
  0x3b   :  { %p2376_p12 = pnand %p2374_p11, %p2371_p10 }
  0x3d   :  { %2379 = shalt.err (!%p2376_p12)
}
  0x3e   :  { %s2380_s0 = scalar_lea.vmem %s53_s16, 4096  ;;  %p2385_p0 = scmp.lt.s32.totalorder %s53_s16, %s53_s16 }
  0x3f   :  { %p2381_p13 = scmp.ne.s32.totalorder %s53_s16, %s2380_s0  ;;  %p2386_p1 = scmp.lt.s32.totalorder %s2380_s0, %s2380_s0 }
  0x41   :  { %p2387_p2 = por %p2386_p1, %p2385_p0 }
  0x43   :  { %p2388_p3 = pnand %p2387_p2, %p2381_p13 }
  0x45   :  { %2391 = shalt.err (!%p2388_p3)
}
  0x46   :  { %58 = dma.hbm_to_vmem [thread:$0]  %s2661_s3, 4096, %s53_s16, [#allocation6], %s2469_s23, %s2469_s23, %s2470_s24  }
  0x47   :  { %s2392_s11 = scalar_lea.hbm %s2665_s7, 2048 }
  0x48   :  { %p2393_p4 = scmp.ne.s32.totalorder %s2665_s7, %s2392_s11  ;;  %p2396_p5 = scmp.lt.u32.totalorder %s2392_s11, %s2665_s7 }
  0x4a   :  { %p2398_p6 = pnand %p2396_p5, %p2393_p4 }
  0x4c   :  { %2401 = shalt.err (!%p2398_p6)
}
  0x4d   :  { %s2402_s15 = scalar_lea.vmem %s81_s18, 2048  ;;  %p2407_p8 = scmp.lt.s32.totalorder %s81_s18, %s81_s18 }
  0x4e   :  { %p2403_p7 = scmp.ne.s32.totalorder %s81_s18, %s2402_s15  ;;  %p2408_p9 = scmp.lt.s32.totalorder %s2402_s15, %s2402_s15 }
  0x50   :  { %p2409_p10 = por %p2408_p9, %p2407_p8 }
  0x52   :  { %p2410_p11 = pnand %p2409_p10, %p2403_p7 }
  0x54   :  { %2413 = shalt.err (!%p2410_p11)
}
  0x55   :  { %s2477_s3 = smov 64   ;;  %s2478_s16 = smov 4  }
  0x56   :  { %86 = dma.hbm_to_vmem [thread:$0]  %s2665_s7, 2048, %s81_s18, [#allocation9], %s2477_s3, %s2477_s3, %s2478_s16  }
  0x57   :  { %2458 = dma.done.wait [#allocation3], 896  }
  0x58   :  { %2459 = vsyncadd [#allocation3], 4294966400 }
  0x59   :  { %2460 = dma.done.wait [#allocation6], 18432  }
  0x5a   :  { %2461 = vsyncadd [#allocation6], 4294948864 }
  0x5b   :  { %2462 = dma.done.wait [#allocation9], 6144  }
  0x5c   :  { %2463 = vsyncadd [#allocation9], 4294961152  ;;  %v2010_v0 = vld [vmem:[#allocation5 + $0x4] ss:$8 sps:$4 sm:$0xff]   ;;  %v2012_v1 = vld [vmem:[#allocation5] ss:$8 sps:$4 sm:$0xff]  }
  0x5d   :  { %833 = vmatprep.subr.bf16.mxu0 %v2010_v0  ;;  %v2013_v2 = vld [vmem:[#allocation5 + $0x14] ss:$8 sps:$4 sm:$0xff]   ;;  %v2015_v3 = vld [vmem:[#allocation5 + $0x10] ss:$8 sps:$4 sm:$0xff]   ;;  %v2016_v4 = vld [vmem:[#allocation5 + $0x24] ss:$8 sps:$4 sm:$0xff]  }
  0x5e   :  { %834 = vmatpush1.bf16.msra.mxu0 %v2012_v1  ;;  %v2018_v5 = vld [vmem:[#allocation5 + $0x20] ss:$8 sps:$4 sm:$0xff]   ;;  %v2019_v6 = vld [vmem:[#allocation5 + $0x34] ss:$8 sps:$4 sm:$0xff]   ;;  %v2021_v7 = vld [vmem:[#allocation5 + $0x30] ss:$8 sps:$4 sm:$0xff]  }
  0x5f   :  { %835 = vmatprep.subr.bf16.mxu0 %v2013_v2  ;;  %v2022_v8 = vld [vmem:[#allocation5 + $0x44] ss:$8 sps:$4 sm:$0xff]   ;;  %v2024_v9 = vld [vmem:[#allocation5 + $0x40] ss:$8 sps:$4 sm:$0xff]   ;;  %v2025_v10 = vld [vmem:[#allocation5 + $0x54] ss:$8 sps:$4 sm:$0xff]  }
  0x60   :  { %v2027_v11 = vld [vmem:[#allocation5 + $0x50] ss:$8 sps:$4 sm:$0xff]   ;;  %v2028_v12 = vld [vmem:[#allocation5 + $0x64] ss:$8 sps:$4 sm:$0xff]   ;;  %v2030_v14 = vld [vmem:[#allocation5 + $0x60] ss:$8 sps:$4 sm:$0xff]  }
  0x61   :  { %v2060_v13 = vld [vmem:[#allocation2 + $0x4] ss:$28 sps:$4 sm:$0xff]   ;;  %v2031_v15 = vld [vmem:[#allocation5 + $0x74] ss:$8 sps:$4 sm:$0xff]   ;;  %v2033_v16 = vld [vmem:[#allocation5 + $0x70] ss:$8 sps:$4 sm:$0xff]  }
  0x62   :  { %836 = vmatpush1.bf16.msra.mxu0 %v2015_v3  ;;  %865 = vmatprep.mubr.bf16.mxu0 %v2060_v13  ;;  %v2034_v17 = vld [vmem:[#allocation5 + $0x84] ss:$8 sps:$4 sm:$0xff]   ;;  %v2036_v18 = vld [vmem:[#allocation5 + $0x80] ss:$8 sps:$4 sm:$0xff]   ;;  %v2037_v19 = vld [vmem:[#allocation5 + $0x94] ss:$8 sps:$4 sm:$0xff]  }
  0x63   :  { %837 = vmatprep.subr.bf16.mxu0 %v2016_v4  ;;  %v2039_v20 = vld [vmem:[#allocation5 + $0x90] ss:$8 sps:$4 sm:$0xff]   ;;  %v2040_v21 = vld [vmem:[#allocation5 + $0xa4] ss:$8 sps:$4 sm:$0xff]   ;;  %v2042_v22 = vld [vmem:[#allocation5 + $0xa0] ss:$8 sps:$4 sm:$0xff]  }
  0x64   :  { %v2043_v23 = vld [vmem:[#allocation5 + $0xb4] ss:$8 sps:$4 sm:$0xff]   ;;  %v2045_v24 = vld [vmem:[#allocation5 + $0xb0] ss:$8 sps:$4 sm:$0xff]   ;;  %v2046_v25 = vld [vmem:[#allocation5 + $0xc4] ss:$8 sps:$4 sm:$0xff]  }
  0x65   :  { %v2048_v26 = vld [vmem:[#allocation5 + $0xc0] ss:$8 sps:$4 sm:$0xff]   ;;  %v2049_v27 = vld [vmem:[#allocation5 + $0xd4] ss:$8 sps:$4 sm:$0xff]   ;;  %v2051_v28 = vld [vmem:[#allocation5 + $0xd0] ss:$8 sps:$4 sm:$0xff]  }
  0x66   :  { %838 = vmatpush1.bf16.msra.mxu0 %v2018_v5  ;;  %v2052_v29 = vld [vmem:[#allocation5 + $0xe4] ss:$8 sps:$4 sm:$0xff]   ;;  %v2054_v30 = vld [vmem:[#allocation5 + $0xe0] ss:$8 sps:$4 sm:$0xff]   ;;  %v2055_v31 = vld [vmem:[#allocation5 + $0xf4] ss:$8 sps:$4 sm:$0xff]  }
  0x67   :  { %839 = vmatprep.subr.bf16.mxu0 %v2019_v6  ;;  %v2136_v32 = vld [vmem:[#allocation5 + $0x304] ss:$8 sps:$4 sm:$0xff]   ;;  %v2057_v33 = vld [vmem:[#allocation5 + $0xf0] ss:$8 sps:$4 sm:$0xff]   ;;  %v2141_v34 = vld [vmem:[#allocation5 + $0x300] ss:$8 sps:$4 sm:$0xff]  }
  0x68   :  { %962 = vmatprep.subr.bf16.mxu1 %v2136_v32  ;;  %v2142_v35 = vld [vmem:[#allocation5 + $0x314] ss:$8 sps:$4 sm:$0xff]   ;;  %v2058_v36 = vld [vmem:[#allocation2] ss:$28 sps:$4 sm:$0xff]   ;;  %v2147_v38 = vld [vmem:[#allocation5 + $0x310] ss:$8 sps:$4 sm:$0xff]  }
  0x69   :  { %v2063_v37 = vld [vmem:[#allocation5 + $0x104] ss:$8 sps:$4 sm:$0xff]   ;;  %963 = vmatpush1.bf16.msra.mxu1 %v2141_v34  ;;  %v2061_v40 = vld [vmem:[#allocation5 + $0x100] ss:$8 sps:$4 sm:$0xff]   ;;  %v2066_v41 = vld [vmem:[#allocation5 + $0x114] ss:$8 sps:$4 sm:$0xff]  }
  0x6a   :  { %840 = vmatpush1.bf16.msra.mxu0 %v2021_v7  ;;  %964 = vmatprep.subr.bf16.mxu1 %v2142_v35  ;;  %v2148_v39 = vld [vmem:[#allocation5 + $0x324] ss:$8 sps:$4 sm:$0xff]   ;;  %v2111_v42 = vld [vmem:[#allocation2 + $0xc] ss:$28 sps:$4 sm:$0xff]   ;;  %v2153_v43 = vld [vmem:[#allocation5 + $0x320] ss:$8 sps:$4 sm:$0xff]  }
  0x6b   :  { %841 = vmatprep.subr.bf16.mxu0 %v2022_v8  ;;  %v2154_v44 = vld [vmem:[#allocation5 + $0x334] ss:$8 sps:$4 sm:$0xff]   ;;  %v2479_v45 = vmov 0   ;;  %v2064_v46 = vld [vmem:[#allocation5 + $0x110] ss:$8 sps:$4 sm:$0xff]   ;;  %s2480_s21 = smov [#allocation11]  }
  0x6c   :  { %994 = vmatprep.mubr.bf16.mxu1 %v2479_v45  ;;  %v2069_v47 = vld [vmem:[#allocation5 + $0x124] ss:$8 sps:$4 sm:$0xff]   ;;  %v2159_v48 = vld [vmem:[#allocation5 + $0x330] ss:$8 sps:$4 sm:$0xff]   ;;  %v2067_v50 = vld [vmem:[#allocation5 + $0x120] ss:$8 sps:$4 sm:$0xff]  }
  0x6d   :  { %965 = vmatpush1.bf16.msra.mxu1 %v2147_v38  ;;  %v2160_v49 = vld [vmem:[#allocation5 + $0x344] ss:$8 sps:$4 sm:$0xff]   ;;  %v2072_v51 = vld [vmem:[#allocation5 + $0x134] ss:$8 sps:$4 sm:$0xff]   ;;  %v2165_v52 = vld [vmem:[#allocation5 + $0x340] ss:$8 sps:$4 sm:$0xff]  }
  0x6e   :  { %842 = vmatpush1.bf16.msra.mxu0 %v2024_v9  ;;  %966 = vmatprep.subr.bf16.mxu1 %v2148_v39  ;;  %v2166_v53 = vld [vmem:[#allocation5 + $0x354] ss:$8 sps:$4 sm:$0xff]   ;;  %v2070_v54 = vld [vmem:[#allocation5 + $0x130] ss:$8 sps:$4 sm:$0xff]   ;;  %v2075_v55 = vld [vmem:[#allocation5 + $0x144] ss:$8 sps:$4 sm:$0xff]  }
  0x6f   :  { %843 = vmatprep.subr.bf16.mxu0 %v2025_v10  ;;  %v2171_v56 = vld [vmem:[#allocation5 + $0x350] ss:$8 sps:$4 sm:$0xff]   ;;  %v2172_v57 = vld [vmem:[#allocation5 + $0x364] ss:$8 sps:$4 sm:$0xff]   ;;  %v2073_v58 = vld [vmem:[#allocation5 + $0x140] ss:$8 sps:$4 sm:$0xff]  }
  0x70   :  { %v2078_v59 = vld [vmem:[#allocation5 + $0x154] ss:$8 sps:$4 sm:$0xff]   ;;  %v2177_v60 = vld [vmem:[#allocation5 + $0x360] ss:$8 sps:$4 sm:$0xff]   ;;  %v2076_v62 = vld [vmem:[#allocation5 + $0x150] ss:$8 sps:$4 sm:$0xff]  }
  0x71   :  { %967 = vmatpush1.bf16.msra.mxu1 %v2153_v43  ;;  %v2178_v61 = vld [vmem:[#allocation5 + $0x374] ss:$8 sps:$4 sm:$0xff]   ;;  %v2081_v63 = vld [vmem:[#allocation5 + $0x164] ss:$8 sps:$4 sm:$0xff]   ;;  %v2183_v0 = vld [vmem:[#allocation5 + $0x370] ss:$8 sps:$4 sm:$0xff]  }
  0x72   :  { %844 = vmatpush1.bf16.msra.mxu0 %v2027_v11  ;;  %968 = vmatprep.subr.bf16.mxu1 %v2154_v44  ;;  %v2190_v1 = vld [vmem:[#allocation7 + $0x4] ss:$8 sps:$4 sm:$0xff]   ;;  %v2079_v2 = vld [vmem:[#allocation5 + $0x160] ss:$8 sps:$4 sm:$0xff]   ;;  %v2084_v4 = vld [vmem:[#allocation5 + $0x174] ss:$8 sps:$4 sm:$0xff]  }
  0x73   :  { %845 = vmatprep.subr.bf16.mxu0 %v2028_v12  ;;  %v2187_v3 = vld [vmem:[#allocation2 + $0x18] ss:$28 sps:$4 sm:$0xff]   ;;  %v2082_v7 = vld [vmem:[#allocation5 + $0x170] ss:$8 sps:$4 sm:$0xff]   ;;  %v2087_v8 = vld [vmem:[#allocation5 + $0x184] ss:$8 sps:$4 sm:$0xff]  }
  0x74   :  { %v2188_v5 = vld [vmem:[#allocation7] ss:$8 sps:$4 sm:$0xff]   ;;  %v2193_v6 = vld [vmem:[#allocation7 + $0x14] ss:$8 sps:$4 sm:$0xff]   ;;  %v2191_v9 = vld [vmem:[#allocation7 + $0x10] ss:$8 sps:$4 sm:$0xff]  }
  0x75   :  { %969 = vmatpush1.bf16.msra.mxu1 %v2159_v48  ;;  %v2196_v10 = vld [vmem:[#allocation7 + $0x24] ss:$8 sps:$4 sm:$0xff]   ;;  %v2085_v11 = vld [vmem:[#allocation5 + $0x180] ss:$8 sps:$4 sm:$0xff]   ;;  %v2090_v12 = vld [vmem:[#allocation5 + $0x194] ss:$8 sps:$4 sm:$0xff]  }
  0x76   :  { %846 = vmatpush1.bf16.msra.mxu0 %v2030_v14  ;;  %970 = vmatprep.subr.bf16.mxu1 %v2160_v49  ;;  %v2194_v13 = vld [vmem:[#allocation7 + $0x20] ss:$8 sps:$4 sm:$0xff]   ;;  %v2199_v14 = vld [vmem:[#allocation7 + $0x34] ss:$8 sps:$4 sm:$0xff]   ;;  %v2105_v32 = vld [vmem:[#allocation5 + $0x1e4] ss:$8 sps:$4 sm:$0xff]  }
  0x77   :  { %847 = vmatprep.subr.bf16.mxu0 %v2031_v15  ;;  %v2088_v15 = vld [vmem:[#allocation5 + $0x190] ss:$8 sps:$4 sm:$0xff]   ;;  %v2214_v34 = vld [vmem:[#allocation7 + $0x84] ss:$8 sps:$4 sm:$0xff]   ;;  %v2103_v35 = vld [vmem:[#allocation5 + $0x1e0] ss:$8 sps:$4 sm:$0xff]  }
  0x78   :  { %v2217_v38 = vld [vmem:[#allocation7 + $0x94] ss:$8 sps:$4 sm:$0xff]   ;;  %v2106_v39 = vld [vmem:[#allocation5 + $0x1f0] ss:$8 sps:$4 sm:$0xff]   ;;  %v2112_v44 = vld [vmem:[#allocation5 + $0x200] ss:$8 sps:$4 sm:$0xff]  }
  0x79   :  { %971 = vmatpush1.bf16.msra.mxu1 %v2165_v52  ;;  %v2109_v43 = vld [vmem:[#allocation2 + $0x8] ss:$28 sps:$4 sm:$0xff]   ;;  %v2186_v45 = vld [vmem:[#allocation2 + $0x14] ss:$28 sps:$4 sm:$0xff]   ;;  %s1724_s22 = sshll.u32 %s2480_s21, 4  ;;  %s1725_s22 = int_to_ptr.vmem [resolvable:$true] %s1724_s22 }
  0x7a   :  { %848 = vmatpush1.bf16.msra.mxu0 %v2033_v16  ;;  %972 = vmatprep.subr.bf16.mxu1 %v2166_v53  ;;  %v2093_v16 = vld [vmem:[#allocation5 + $0x1a4] ss:$8 sps:$4 sm:$0xff]   ;;  %v2223_v48 = vld [vmem:[#allocation7 + $0xb4] ss:$8 sps:$4 sm:$0xff]   ;;  %v2115_v49 = vld [vmem:[#allocation5 + $0x210] ss:$8 sps:$4 sm:$0xff]   ;;  %p2419_p13 = scmp.lt.s32.totalorder %s1725_s22, %s1725_s22 }
  0x7b   :  { %849 = vmatprep.subr.bf16.mxu0 %v2034_v17  ;;  %v2197_v17 = vld [vmem:[#allocation7 + $0x30] ss:$8 sps:$4 sm:$0xff]   ;;  %v2226_v52 = vld [vmem:[#allocation7 + $0xc4] ss:$8 sps:$4 sm:$0xff]   ;;  %v2118_v53 = vld [vmem:[#allocation5 + $0x220] ss:$8 sps:$4 sm:$0xff]  }
  0x7c   :  { %s2414_s25 = scalar_lea.vmem %s1725_s22, 256 }
  0x7d   :  { %973 = vmatpush1.bf16.msra.mxu1 %v2171_v56  ;;  %v2121_v56 = vld [vmem:[#allocation5 + $0x230] ss:$8 sps:$4 sm:$0xff]   ;;  %p2415_p12 = scmp.ne.s32.totalorder %s1725_s22, %s2414_s25  ;;  %p2420_p0 = scmp.lt.s32.totalorder %s2414_s25, %s2414_s25 }
  0x7e   :  { %850 = vmatpush1.bf16.msra.mxu0 %v2036_v18  ;;  %974 = vmatprep.subr.bf16.mxu1 %v2172_v57  ;;  %v2202_v18 = vld [vmem:[#allocation7 + $0x44] ss:$8 sps:$4 sm:$0xff]  }
  0x7f   :  { %851 = vmatprep.subr.bf16.mxu0 %v2037_v19  ;;  %v2091_v19 = vld [vmem:[#allocation5 + $0x1a0] ss:$8 sps:$4 sm:$0xff]   ;;  %v2126_v57 = vld [vmem:[#allocation5 + $0x244] ss:$8 sps:$4 sm:$0xff]   ;;  %p2421_p1 = por %p2420_p0, %p2419_p13 }
  0x81   :  { %975 = vmatpush1.bf16.msra.mxu1 %v2177_v60  ;;  %v2127_v60 = vld [vmem:[#allocation5 + $0x250] ss:$8 sps:$4 sm:$0xff]   ;;  %p2422_p2 = pnand %p2421_p1, %p2415_p12 }
  0x82   :  { %852 = vmatpush1.bf16.msra.mxu0 %v2039_v20  ;;  %976 = vmatprep.subr.bf16.mxu1 %v2178_v61  ;;  %v2096_v20 = vld [vmem:[#allocation5 + $0x1b4] ss:$8 sps:$4 sm:$0xff]   ;;  %v2132_v61 = vld [vmem:[#allocation5 + $0x264] ss:$8 sps:$4 sm:$0xff]  }
  0x83   :  { %853 = vmatprep.subr.bf16.mxu0 %v2040_v21  ;;  %v2200_v21 = vld [vmem:[#allocation7 + $0x40] ss:$8 sps:$4 sm:$0xff]  }
  0x85   :  { %977 = vmatpush1.bf16.msra.mxu1 %v2183_v0  ;;  %v2133_v0 = vld [vmem:[#allocation5 + $0x270] ss:$8 sps:$4 sm:$0xff]  }
  0x86   :  { %854 = vmatpush1.bf16.msra.mxu0 %v2042_v22  ;;  %1215 = vmatprep.subr.bf16.mxu1 %v2190_v1  ;;  %v2205_v22 = vld [vmem:[#allocation7 + $0x54] ss:$8 sps:$4 sm:$0xff]   ;;  %v2140_v1 = vld [vmem:[#allocation5 + $0x284] ss:$8 sps:$4 sm:$0xff]  }
  0x87   :  { %855 = vmatprep.subr.bf16.mxu0 %v2043_v23  ;;  %v2094_v23 = vld [vmem:[#allocation5 + $0x1b0] ss:$8 sps:$4 sm:$0xff]  }
  0x88   :  { %995 = vmatmul.mubr.bf16.vlgmr.msra.gmra.mrb[0].mxu1 %v2187_v3  ;;  %v2146_v3 = vld [vmem:[#allocation5 + $0x294] ss:$8 sps:$4 sm:$0xff]  }
  0x89   :  { %1216 = vmatpush1.bf16.msra.mxu1 %v2188_v5  ;;  %v2152_v5 = vld [vmem:[#allocation5 + $0x2a4] ss:$8 sps:$4 sm:$0xff]  }
  0x8a   :  { %856 = vmatpush1.bf16.msra.mxu0 %v2045_v24  ;;  %1217 = vmatprep.subr.bf16.mxu1 %v2193_v6  ;;  %v2099_v24 = vld [vmem:[#allocation5 + $0x1c4] ss:$8 sps:$4 sm:$0xff]   ;;  %v2150_v6 = vld [vmem:[#allocation5 + $0x2a0] ss:$8 sps:$4 sm:$0xff]  }
  0x8b   :  { %857 = vmatprep.subr.bf16.mxu0 %v2046_v25  ;;  %v2203_v25 = vld [vmem:[#allocation7 + $0x50] ss:$8 sps:$4 sm:$0xff]  }
  0x8d   :  { %1218 = vmatpush1.bf16.msra.mxu1 %v2191_v9  ;;  %v2164_v9 = vld [vmem:[#allocation5 + $0x2c4] ss:$8 sps:$4 sm:$0xff]  }
  0x8e   :  { %858 = vmatpush1.bf16.msra.mxu0 %v2048_v26  ;;  %1219 = vmatprep.subr.bf16.mxu1 %v2196_v10  ;;  %v2208_v26 = vld [vmem:[#allocation7 + $0x64] ss:$8 sps:$4 sm:$0xff]   ;;  %v2162_v10 = vld [vmem:[#allocation5 + $0x2c0] ss:$8 sps:$4 sm:$0xff]  }
  0x8f   :  { %859 = vmatprep.subr.bf16.mxu0 %v2049_v27  ;;  %v2097_v27 = vld [vmem:[#allocation5 + $0x1c0] ss:$8 sps:$4 sm:$0xff]  }
  0x91   :  { %1220 = vmatpush1.bf16.msra.mxu1 %v2194_v13  ;;  %v2176_v13 = vld [vmem:[#allocation5 + $0x2e4] ss:$8 sps:$4 sm:$0xff]  }
  0x92   :  { %860 = vmatpush1.bf16.msra.mxu0 %v2051_v28  ;;  %1221 = vmatprep.subr.bf16.mxu1 %v2199_v14  ;;  %v2102_v28 = vld [vmem:[#allocation5 + $0x1d4] ss:$8 sps:$4 sm:$0xff]   ;;  %v2174_v14 = vld [vmem:[#allocation5 + $0x2e0] ss:$8 sps:$4 sm:$0xff]  }
  0x93   :  { %861 = vmatprep.subr.bf16.mxu0 %v2052_v29  ;;  %v2206_v29 = vld [vmem:[#allocation7 + $0x60] ss:$8 sps:$4 sm:$0xff]  }
  0x95   :  { %1222 = vmatpush1.bf16.msra.mxu1 %v2197_v17  ;;  %v2184_v17 = vld [vmem:[#allocation2 + $0x10] ss:$28 sps:$4 sm:$0xff]  }
  0x96   :  { %862 = vmatpush1.bf16.msra.mxu0 %v2054_v30  ;;  %1223 = vmatprep.subr.bf16.mxu1 %v2202_v18  ;;  %v2211_v30 = vld [vmem:[#allocation7 + $0x74] ss:$8 sps:$4 sm:$0xff]  }
  0x97   :  { %863 = vmatprep.subr.bf16.mxu0 %v2055_v31  ;;  %v2100_v31 = vld [vmem:[#allocation5 + $0x1d0] ss:$8 sps:$4 sm:$0xff]   ;;  %v2229_v18 = vld [vmem:[#allocation7 + $0xd4] ss:$8 sps:$4 sm:$0xff]  }
  0x99   :  { %1224 = vmatpush1.bf16.msra.mxu1 %v2200_v21  ;;  %v2230_v21 = vld [vmem:[#allocation7 + $0xe0] ss:$8 sps:$4 sm:$0xff]  }
  0x9a   :  { %864 = vmatpush1.bf16.msra.mxu0 %v2057_v33  ;;  %1225 = vmatprep.subr.bf16.mxu1 %v2205_v22  ;;  %v2209_v33 = vld [vmem:[#allocation7 + $0x70] ss:$8 sps:$4 sm:$0xff]   ;;  %v2235_v22 = vld [vmem:[#allocation7 + $0xf4] ss:$8 sps:$4 sm:$0xff]  }
  0x9b   :  { %876 = vmatprep.subr.bf16.mxu0 %v2063_v37  ;;  %v2212_v37 = vld [vmem:[#allocation7 + $0x80] ss:$8 sps:$4 sm:$0xff]  }
  0x9d   :  { %866 = vmatmul.mubr.bf16.vlgmr.msra.gmra.mrb[0].mxu0 %v2058_v36  ;;  %1226 = vmatpush1.bf16.msra.mxu1 %v2203_v25  ;;  %v2108_v36 = vld [vmem:[#allocation5 + $0x1f4] ss:$8 sps:$4 sm:$0xff]  }
  0x9e   :  { %877 = vmatpush1.bf16.msra.mxu0 %v2061_v40  ;;  %908 = vmatprep.mubr.bf16.mxu0 %v2111_v42  ;;  %v2114_v40 = vld [vmem:[#allocation5 + $0x204] ss:$8 sps:$4 sm:$0xff]  }
  0x9f   :  { %878 = vmatprep.subr.bf16.mxu0 %v2066_v41  ;;  %1227 = vmatprep.subr.bf16.mxu1 %v2208_v26  ;;  %v2215_v41 = vld [vmem:[#allocation7 + $0x90] ss:$8 sps:$4 sm:$0xff]   ;;  %v2220_v42 = vld [vmem:[#allocation7 + $0xa4] ss:$8 sps:$4 sm:$0xff]  }
  0xa1   :  { %1228 = vmatpush1.bf16.msra.mxu1 %v2206_v29  ;;  %v227_v29 = vlaneseq }
  0xa2   :  { %879 = vmatpush1.bf16.msra.mxu0 %v2064_v46  ;;  %1229 = vmatprep.subr.bf16.mxu1 %v2211_v30  ;;  %v2117_v46 = vld [vmem:[#allocation5 + $0x214] ss:$8 sps:$4 sm:$0xff]  }
  0xa3   :  { %880 = vmatprep.subr.bf16.mxu0 %v2069_v47  ;;  %v2218_v47 = vld [vmem:[#allocation7 + $0xa0] ss:$8 sps:$4 sm:$0xff]   ;;  %v228_v30 = vshrl.u32 %v227_v29, 7 }
  0xa5   :  { %1230 = vmatpush1.bf16.msra.mxu1 %v2209_v33  ;;  %v2611_v33 = vsub.s32 1, %v228_v30 }
  0xa6   :  { %881 = vmatpush1.bf16.msra.mxu0 %v2067_v50  ;;  %1231 = vmatprep.subr.bf16.mxu1 %v2214_v34  ;;  %v2120_v50 = vld [vmem:[#allocation5 + $0x224] ss:$8 sps:$4 sm:$0xff]  }
  0xa7   :  { %882 = vmatprep.subr.bf16.mxu0 %v2072_v51  ;;  %v2221_v51 = vld [vmem:[#allocation7 + $0xb0] ss:$8 sps:$4 sm:$0xff]  }
  0xa9   :  { %1232 = vmatpush1.bf16.msra.mxu1 %v2212_v37 }
  0xaa   :  { %883 = vmatpush1.bf16.msra.mxu0 %v2070_v54  ;;  %1233 = vmatprep.subr.bf16.mxu1 %v2217_v38  ;;  %v2123_v54 = vld [vmem:[#allocation5 + $0x234] ss:$8 sps:$4 sm:$0xff]  }
  0xab   :  { %884 = vmatprep.subr.bf16.mxu0 %v2075_v55  ;;  %v2224_v55 = vld [vmem:[#allocation7 + $0xc0] ss:$8 sps:$4 sm:$0xff]  }
  0xad   :  { %1234 = vmatpush1.bf16.msra.mxu1 %v2215_v41 }
  0xae   :  { %885 = vmatpush1.bf16.msra.mxu0 %v2073_v58  ;;  %1235 = vmatprep.subr.bf16.mxu1 %v2220_v42  ;;  %v2124_v58 = vld [vmem:[#allocation5 + $0x240] ss:$8 sps:$4 sm:$0xff]  }
  0xaf   :  { %886 = vmatprep.subr.bf16.mxu0 %v2078_v59  ;;  %v2129_v59 = vld [vmem:[#allocation5 + $0x254] ss:$8 sps:$4 sm:$0xff]  }
  0xb1   :  { %1236 = vmatpush1.bf16.msra.mxu1 %v2218_v47 }
  0xb2   :  { %887 = vmatpush1.bf16.msra.mxu0 %v2076_v62  ;;  %1237 = vmatprep.subr.bf16.mxu1 %v2223_v48  ;;  %v2130_v62 = vld [vmem:[#allocation5 + $0x260] ss:$8 sps:$4 sm:$0xff]  }
  0xb3   :  { %888 = vmatprep.subr.bf16.mxu0 %v2081_v63  ;;  %v2135_v63 = vld [vmem:[#allocation5 + $0x274] ss:$8 sps:$4 sm:$0xff]  }
  0xb5   :  { %1238 = vmatpush1.bf16.msra.mxu1 %v2221_v51 }
  0xb6   :  { %889 = vmatpush1.bf16.msra.mxu0 %v2079_v2  ;;  %1239 = vmatprep.subr.bf16.mxu1 %v2226_v52  ;;  %v2138_v2 = vld [vmem:[#allocation5 + $0x280] ss:$8 sps:$4 sm:$0xff]  }
  0xb7   :  { %890 = vmatprep.subr.bf16.mxu0 %v2084_v4  ;;  %v2144_v4 = vld [vmem:[#allocation5 + $0x290] ss:$8 sps:$4 sm:$0xff]  }
  0xb9   :  { %1240 = vmatpush1.bf16.msra.mxu1 %v2224_v55  ;;  %v2241_v55 = vld [vmem:[#allocation8 + $0x14] ss:$8 sps:$4 sm:$0xff]  }
  0xba   :  { %891 = vmatpush1.bf16.msra.mxu0 %v2082_v7  ;;  %v2158_v7 = vld [vmem:[#allocation5 + $0x2b4] ss:$8 sps:$4 sm:$0xff]   ;;  %1241 = vmatprep.subr.bf16.mxu1 %v2229_v18  ;;  %v2278_v18 = vld [vmem:[#allocation8 + $0xe0] ss:$8 sps:$4 sm:$0xff]  }
  0xbb   :  { %892 = vmatprep.subr.bf16.mxu0 %v2087_v8  ;;  %v2156_v8 = vld [vmem:[#allocation5 + $0x2b0] ss:$8 sps:$4 sm:$0xff]  }
  0xbe   :  { %893 = vmatpush1.bf16.msra.mxu0 %v2085_v11  ;;  %v2170_v11 = vld [vmem:[#allocation5 + $0x2d4] ss:$8 sps:$4 sm:$0xff]  }
  0xbf   :  { %894 = vmatprep.subr.bf16.mxu0 %v2090_v12  ;;  %v2168_v12 = vld [vmem:[#allocation5 + $0x2d0] ss:$8 sps:$4 sm:$0xff]  }
  0xc2   :  { %895 = vmatpush1.bf16.msra.mxu0 %v2088_v15  ;;  %v2182_v15 = vld [vmem:[#allocation5 + $0x2f4] ss:$8 sps:$4 sm:$0xff]  }
  0xc3   :  { %896 = vmatprep.subr.bf16.mxu0 %v2093_v16  ;;  %v2180_v16 = vld [vmem:[#allocation5 + $0x2f0] ss:$8 sps:$4 sm:$0xff]  }
  0xc6   :  { %897 = vmatpush1.bf16.msra.mxu0 %v2091_v19  ;;  %v2227_v19 = vld [vmem:[#allocation7 + $0xd0] ss:$8 sps:$4 sm:$0xff]  }
  0xc7   :  { %898 = vmatprep.subr.bf16.mxu0 %v2096_v20  ;;  %1242 = vmatpush1.bf16.msra.mxu1 %v2227_v19  ;;  %v2232_v20 = vld [vmem:[#allocation7 + $0xe4] ss:$8 sps:$4 sm:$0xff]   ;;  %v2283_v19 = vld [vmem:[#allocation8 + $0xf4] ss:$8 sps:$4 sm:$0xff]  }
  0xc8   :  { %1243 = vmatprep.subr.bf16.mxu1 %v2232_v20  ;;  %v2281_v20 = vld [vmem:[#allocation8 + $0xf0] ss:$8 sps:$4 sm:$0xff]  }
  0xca   :  { %899 = vmatpush1.bf16.msra.mxu0 %v2094_v23  ;;  %v2233_v23 = vld [vmem:[#allocation7 + $0xf0] ss:$8 sps:$4 sm:$0xff]  }
  0xcb   :  { %900 = vmatprep.subr.bf16.mxu0 %v2099_v24  ;;  %1244 = vmatpush1.bf16.msra.mxu1 %v2230_v21  ;;  %v2238_v24 = vld [vmem:[#allocation8 + $0x4] ss:$8 sps:$4 sm:$0xff]  }
  0xcc   :  { %1245 = vmatprep.subr.bf16.mxu1 %v2235_v22  ;;  %v2284_v21 = vld [vmem:[#allocation10 + $0x40] sm:$0xff]   ;;  %v1043_v22 = vld [vmem:[%s2662_s4] sm:$0x3] }
  0xce   :  { %901 = vmatpush1.bf16.msra.mxu0 %v2097_v27 }
  0xcf   :  { %902 = vmatprep.subr.bf16.mxu0 %v2102_v28  ;;  %1246 = vmatpush1.bf16.msra.mxu1 %v2233_v23 }
  0xd0   :  { %1480 = vmatprep.subr.bf16.mxu1 %v2238_v24  ;;  %v1052_v24 = vrot.slane %v1043_v22, %v2611_v33 }
  0xd2   :  { %903 = vmatpush1.bf16.msra.mxu0 %v2100_v31  ;;  %v2606_v31 = vsub.s32 0, %v228_v30 }
  0xd3   :  { %904 = vmatprep.subr.bf16.mxu0 %v2105_v32  ;;  %v225_v32 = vld [vmem:[%s2660_s2] sm:$0x3] }
  0xd4   :  { %v230_v34 = vrot.slane %v225_v32, %v2606_v31  ;;  %v1048_v23 = vrot.slane %v1043_v22, %v2606_v31 }
  0xd6   :  { %905 = vmatpush1.bf16.msra.mxu0 %v2103_v35  ;;  %v234_v35 = vrot.slane %v225_v32, %v2611_v33 }
  0xd7   :  { %906 = vmatprep.subr.bf16.mxu0 %v2108_v36 }
  0xda   :  { %907 = vmatpush1.bf16.msra.mxu0 %v2106_v39 }
  0xdb   :  { %919 = vmatprep.subr.bf16.mxu0 %v2114_v40 }
  0xdd   :  { %909 = vmatmul.mubr.bf16.vlgmr.msra.gmra.mrb[0].mxu0 %v2109_v43 }
  0xde   :  { %920 = vmatpush1.bf16.msra.mxu0 %v2112_v44  ;;  %951 = vmatprep.mubr.bf16.mxu0 %v2186_v45 }
  0xdf   :  { %921 = vmatprep.subr.bf16.mxu0 %v2117_v46 }
  0xe2   :  { %922 = vmatpush1.bf16.msra.mxu0 %v2115_v49 }
  0xe3   :  { %923 = vmatprep.subr.bf16.mxu0 %v2120_v50 }
  0xe6   :  { %924 = vmatpush1.bf16.msra.mxu0 %v2118_v53 }
  0xe7   :  { %925 = vmatprep.subr.bf16.mxu0 %v2123_v54  ;;  %v2236_v54 = vld [vmem:[#allocation8] ss:$8 sps:$4 sm:$0xff]  }
  0xea   :  { %926 = vmatpush1.bf16.msra.mxu0 %v2121_v56  ;;  %v2239_v56 = vld [vmem:[#allocation8 + $0x10] ss:$8 sps:$4 sm:$0xff]  }
  0xeb   :  { %927 = vmatprep.subr.bf16.mxu0 %v2126_v57  ;;  %v2244_v57 = vld [vmem:[#allocation8 + $0x24] ss:$8 sps:$4 sm:$0xff]  }
  0xee   :  { %928 = vmatpush1.bf16.msra.mxu0 %v2124_v58  ;;  %v2242_v58 = vld [vmem:[#allocation8 + $0x20] ss:$8 sps:$4 sm:$0xff]  }
  0xef   :  { %929 = vmatprep.subr.bf16.mxu0 %v2129_v59  ;;  %v2247_v59 = vld [vmem:[#allocation8 + $0x34] ss:$8 sps:$4 sm:$0xff]  }
  0xf2   :  { %930 = vmatpush1.bf16.msra.mxu0 %v2127_v60  ;;  %v2245_v60 = vld [vmem:[#allocation8 + $0x30] ss:$8 sps:$4 sm:$0xff]  }
  0xf3   :  { %931 = vmatprep.subr.bf16.mxu0 %v2132_v61  ;;  %v2250_v61 = vld [vmem:[#allocation8 + $0x44] ss:$8 sps:$4 sm:$0xff]  }
  0xf6   :  { %932 = vmatpush1.bf16.msra.mxu0 %v2130_v62  ;;  %v2248_v62 = vld [vmem:[#allocation8 + $0x40] ss:$8 sps:$4 sm:$0xff]  }
  0xf7   :  { %933 = vmatprep.subr.bf16.mxu0 %v2135_v63  ;;  %v2253_v63 = vld [vmem:[#allocation8 + $0x54] ss:$8 sps:$4 sm:$0xff]  }
  0xfa   :  { %934 = vmatpush1.bf16.msra.mxu0 %v2133_v0  ;;  %v2251_v0 = vld [vmem:[#allocation8 + $0x50] ss:$8 sps:$4 sm:$0xff]  }
  0xfb   :  { %935 = vmatprep.subr.bf16.mxu0 %v2140_v1  ;;  %v2256_v1 = vld [vmem:[#allocation8 + $0x64] ss:$8 sps:$4 sm:$0xff]  }
  0xfe   :  { %936 = vmatpush1.bf16.msra.mxu0 %v2138_v2  ;;  %v2254_v2 = vld [vmem:[#allocation8 + $0x60] ss:$8 sps:$4 sm:$0xff]  }
  0xff   :  { %937 = vmatprep.subr.bf16.mxu0 %v2146_v3  ;;  %v2259_v3 = vld [vmem:[#allocation8 + $0x74] ss:$8 sps:$4 sm:$0xff]  }
 0x102   :  { %938 = vmatpush1.bf16.msra.mxu0 %v2144_v4  ;;  %v2257_v4 = vld [vmem:[#allocation8 + $0x70] ss:$8 sps:$4 sm:$0xff]  }
 0x103   :  { %939 = vmatprep.subr.bf16.mxu0 %v2152_v5  ;;  %v2262_v5 = vld [vmem:[#allocation8 + $0x84] ss:$8 sps:$4 sm:$0xff]  }
 0x106   :  { %940 = vmatpush1.bf16.msra.mxu0 %v2150_v6  ;;  %v2260_v6 = vld [vmem:[#allocation8 + $0x80] ss:$8 sps:$4 sm:$0xff]  }
 0x107   :  { %941 = vmatprep.subr.bf16.mxu0 %v2158_v7  ;;  %v2265_v7 = vld [vmem:[#allocation8 + $0x94] ss:$8 sps:$4 sm:$0xff]  }
 0x10a   :  { %942 = vmatpush1.bf16.msra.mxu0 %v2156_v8  ;;  %v2263_v8 = vld [vmem:[#allocation8 + $0x90] ss:$8 sps:$4 sm:$0xff]  }
 0x10b   :  { %943 = vmatprep.subr.bf16.mxu0 %v2164_v9  ;;  %v2268_v9 = vld [vmem:[#allocation8 + $0xa4] ss:$8 sps:$4 sm:$0xff]  }
 0x10e   :  { %944 = vmatpush1.bf16.msra.mxu0 %v2162_v10  ;;  %v2266_v10 = vld [vmem:[#allocation8 + $0xa0] ss:$8 sps:$4 sm:$0xff]  }
 0x10f   :  { %945 = vmatprep.subr.bf16.mxu0 %v2170_v11  ;;  %v2271_v11 = vld [vmem:[#allocation8 + $0xb4] ss:$8 sps:$4 sm:$0xff]  }
 0x112   :  { %946 = vmatpush1.bf16.msra.mxu0 %v2168_v12  ;;  %v2269_v12 = vld [vmem:[#allocation8 + $0xb0] ss:$8 sps:$4 sm:$0xff]  }
 0x113   :  { %947 = vmatprep.subr.bf16.mxu0 %v2176_v13  ;;  %v2274_v13 = vld [vmem:[#allocation8 + $0xc4] ss:$8 sps:$4 sm:$0xff]  }
 0x116   :  { %948 = vmatpush1.bf16.msra.mxu0 %v2174_v14  ;;  %v2272_v14 = vld [vmem:[#allocation8 + $0xc0] ss:$8 sps:$4 sm:$0xff]  }
 0x117   :  { %949 = vmatprep.subr.bf16.mxu0 %v2182_v15  ;;  %v2277_v15 = vld [vmem:[#allocation8 + $0xd4] ss:$8 sps:$4 sm:$0xff]  }
 0x11a   :  { %950 = vmatpush1.bf16.msra.mxu0 %v2180_v16  ;;  %v2275_v16 = vld [vmem:[#allocation8 + $0xd0] ss:$8 sps:$4 sm:$0xff]  }
 0x11d   :  { %952 = vmatmul.mubr.bf16.vlgmr.msra.gmra.mrb[0].mxu0 %v2184_v17  ;;  %v2280_v17 = vld [vmem:[#allocation8 + $0xe4] ss:$8 sps:$4 sm:$0xff]  }
 0x15b   :  { %v996_v25 = vpop.f32.mrb[0].mxu1 }
 0x15c   :  { %v998_v26 = vpop.f32.mrb[1].mxu1 }
 0x15d   :  { %v1000_v27 = vpop.f32.mrb[2].mxu1 }
 0x15e   :  { %v1002_v28 = vpop.f32.mrb[3].mxu1 }
 0x1f0   :  { %v953_v36 = vpop.f32.mrb[0].mxu0 }
 0x1f1   :  { %v1980_v37 = vadd.f32 %v953_v36, %v230_v34  ;;  %v955_v38 = vpop.f32.mrb[1].mxu0 }
 0x1f2   :  { %v1982_v39 = vadd.f32 %v955_v38, %v234_v35  ;;  %v957_v40 = vpop.f32.mrb[2].mxu0 }
 0x1f3   :  { %v1981_v41 = vadd.f32 %v1980_v37, %v996_v25  ;;  %v1984_v42 = vadd.f32 %v957_v40, %v230_v34  ;;  %v959_v43 = vpop.f32.mrb[3].mxu0 }
 0x1f4   :  { %v1983_v44 = vadd.f32 %v1982_v39, %v998_v26  ;;  %v1986_v45 = vadd.f32 %v959_v43, %v234_v35  ;;  %v2285_v43 = vld [vmem:[#allocation10] sm:$0xff]  }
 0x1f5   :  { %v1985_v46 = vadd.f32 %v1984_v42, %v1000_v27  ;;  %v1005_v48 = vmax.f32 %v1981_v41, 0.0 }
 0x1f6   :  { %v1987_v47 = vadd.f32 %v1986_v45, %v1002_v28  ;;  %v1006_v50 = vmax.f32 %v1983_v44, 0.0  ;;  %v2286_v44 = vld [vmem:[#allocation10 + $0x48] sm:$0xff]  }
 0x1f7   :  { %v1007_v49 = vmax.f32 %v1985_v46, 0.0  ;;  %v2287_v45 = vld [vmem:[#allocation10 + $0x8] sm:$0xff]   ;;  %v2288_v46 = vld [vmem:[#allocation10 + $0x50] sm:$0xff]  }
 0x1f8   :  { %v1008_v51 = vmax.f32 %v1987_v47, 0.0  ;;  %v2289_v47 = vld [vmem:[#allocation10 + $0x10] sm:$0xff]  }
 0x1f9   :  { %v1009_v52 = vpack.c.bf16 %v1007_v49, %v1005_v48  ;;  %v2290_v48 = vld [vmem:[#allocation10 + $0x58] sm:$0xff]  }
 0x1fa   :  { %v1010_v53 = vpack.c.bf16 %v1008_v51, %v1006_v50  ;;  %v2291_v49 = vld [vmem:[#allocation10 + $0x18] sm:$0xff]   ;;  %v2292_v50 = vld [vmem:[#allocation10 + $0x60] sm:$0xff]  }
 0x1fb   :  { %v2293_v51 = vld [vmem:[#allocation10 + $0x20] sm:$0xff]  }
 0x1fc   :  { %1247 = vmatprep.mubr.bf16.mxu1 %v1010_v53  ;;  %v2295_v53 = vld [vmem:[#allocation10 + $0x28] sm:$0xff]  }
 0x1fd   :  { %1248 = vmatmul.mubr.bf16.vlgmr.msra.gmra.mrb[4].mxu1 %v1009_v52  ;;  %v2294_v52 = vld [vmem:[#allocation10 + $0x68] sm:$0xff]  }
 0x1fe   :  { %1481 = vmatpush1.bf16.msra.mxu1 %v2236_v54  ;;  %v2296_v54 = vld [vmem:[#allocation10 + $0x70] sm:$0xff]  }
 0x1ff   :  { %1482 = vmatprep.subr.bf16.mxu1 %v2241_v55  ;;  %v2297_v55 = vld [vmem:[#allocation10 + $0x30] sm:$0xff]  }
 0x202   :  { %1483 = vmatpush1.bf16.msra.mxu1 %v2239_v56  ;;  %v2298_v56 = vld [vmem:[#allocation10 + $0x78] sm:$0xff]  }
 0x203   :  { %1484 = vmatprep.subr.bf16.mxu1 %v2244_v57  ;;  %v2299_v57 = vld [vmem:[#allocation10 + $0x38] sm:$0xff]  }
 0x206   :  { %1485 = vmatpush1.bf16.msra.mxu1 %v2242_v58  ;;  %v1308_v58 = vld [vmem:[%s2664_s6] sm:$0x3] }
 0x207   :  { %1486 = vmatprep.subr.bf16.mxu1 %v2247_v59  ;;  %v1313_v59 = vrot.slane %v1308_v58, %v2606_v31 }
 0x20a   :  { %1487 = vmatpush1.bf16.msra.mxu1 %v2245_v60  ;;  %v1317_v60 = vrot.slane %v1308_v58, %v2611_v33  ;;  %v1939_v33 = vld [vmem:[%s2666_s8] ss:$0 sm:$0xff] }
 0x20b   :  { %1488 = vmatprep.subr.bf16.mxu1 %v2250_v61 }
 0x20e   :  { %1489 = vmatpush1.bf16.msra.mxu1 %v2248_v62 }
 0x20f   :  { %1490 = vmatprep.subr.bf16.mxu1 %v2253_v63 }
 0x212   :  { %1491 = vmatpush1.bf16.msra.mxu1 %v2251_v0 }
 0x213   :  { %1492 = vmatprep.subr.bf16.mxu1 %v2256_v1 }
 0x216   :  { %1493 = vmatpush1.bf16.msra.mxu1 %v2254_v2 }
 0x217   :  { %1494 = vmatprep.subr.bf16.mxu1 %v2259_v3 }
 0x21a   :  { %1495 = vmatpush1.bf16.msra.mxu1 %v2257_v4 }
 0x21b   :  { %1496 = vmatprep.subr.bf16.mxu1 %v2262_v5 }
 0x21e   :  { %1497 = vmatpush1.bf16.msra.mxu1 %v2260_v6 }
 0x21f   :  { %1498 = vmatprep.subr.bf16.mxu1 %v2265_v7 }
 0x222   :  { %1499 = vmatpush1.bf16.msra.mxu1 %v2263_v8 }
 0x223   :  { %1500 = vmatprep.subr.bf16.mxu1 %v2268_v9 }
 0x226   :  { %1501 = vmatpush1.bf16.msra.mxu1 %v2266_v10 }
 0x227   :  { %1502 = vmatprep.subr.bf16.mxu1 %v2271_v11 }
 0x22a   :  { %1503 = vmatpush1.bf16.msra.mxu1 %v2269_v12 }
 0x22b   :  { %1504 = vmatprep.subr.bf16.mxu1 %v2274_v13 }
 0x22e   :  { %1505 = vmatpush1.bf16.msra.mxu1 %v2272_v14 }
 0x22f   :  { %1506 = vmatprep.subr.bf16.mxu1 %v2277_v15 }
 0x232   :  { %1507 = vmatpush1.bf16.msra.mxu1 %v2275_v16 }
 0x233   :  { %1508 = vmatprep.subr.bf16.mxu1 %v2280_v17 }
 0x236   :  { %1509 = vmatpush1.bf16.msra.mxu1 %v2278_v18 }
 0x237   :  { %1510 = vmatprep.subr.bf16.mxu1 %v2283_v19 }
 0x23a   :  { %1511 = vmatpush1.bf16.msra.mxu1 %v2281_v20 }
 0x23b   :  { %1958 = vmatprep.subr.bf16.mxu1 %v2284_v21 }
 0x2d0   :  { %v1249_v25 = vpop.f32.mrb[4].mxu1 }
 0x2d1   :  { %v1250_v26 = vadd.f32 %v1249_v25, %v1048_v23  ;;  %v1251_v27 = vpop.f32.mrb[5].mxu1 }
 0x2d2   :  { %v1252_v28 = vadd.f32 %v1251_v27, %v1052_v24  ;;  %v1253_v29 = vpop.f32.mrb[6].mxu1 }
 0x2d3   :  { %v1258_v30 = vmax.f32 %v1250_v26, 0.0  ;;  %v1254_v32 = vadd.f32 %v1253_v29, %v1048_v23  ;;  %v1255_v34 = vpop.f32.mrb[7].mxu1 }
 0x2d4   :  { %v1259_v35 = vmax.f32 %v1252_v28, 0.0  ;;  %v1256_v36 = vadd.f32 %v1255_v34, %v1052_v24 }
 0x2d5   :  { %v1260_v37 = vmax.f32 %v1254_v32, 0.0 }
 0x2d6   :  { %v1956_v38 = vpack.c.bf16 %v1259_v35, %v1258_v30  ;;  %v1261_v39 = vmax.f32 %v1256_v36, 0.0 }
 0x2d7   :  { %v1262_v40 = vpack.c.bf16 %v1260_v37, %v1258_v30 }
 0x2d8   :  { %1274 = vst [vmem:[#allocation11] sm:$0xff] %v1956_v38  ;;  %v1263_v41 = vpack.c.bf16 %v1261_v39, %v1259_v35  ;;  %v1957_v42 = vpack.c.bf16 %v1261_v39, %v1260_v37 }
 0x2da   :  { %1275 = vst [vmem:[#allocation11 + $0x8] sm:$0xff] %v1957_v42  ;;  %1512 = vmatprep.mubr.bf16.mxu1 %v1263_v41 }
 0x2db   :  { %1513 = vmatmul.mubr.bf16.vlgmr.msra.gmra.mrb[8].mxu1 %v1262_v40 }
 0x2dc   :  { %1959 = vmatpush3.bf16.msra.mxu1 %v2285_v43 }
 0x2dd   :  { %1960 = vmatprep.subr.bf16.mxu1 %v2286_v44 }
 0x2e0   :  { %1961 = vmatpush3.bf16.msra.mxu1 %v2287_v45 }
 0x2e1   :  { %1962 = vmatprep.subr.bf16.mxu1 %v2288_v46 }
 0x2e4   :  { %1963 = vmatpush3.bf16.msra.mxu1 %v2289_v47 }
 0x2e5   :  { %1964 = vmatprep.subr.bf16.mxu1 %v2290_v48 }
 0x2e8   :  { %1965 = vmatpush3.bf16.msra.mxu1 %v2291_v49 }
 0x2e9   :  { %1966 = vmatprep.subr.bf16.mxu1 %v2292_v50 }
 0x2ec   :  { %1967 = vmatpush3.bf16.msra.mxu1 %v2293_v51 }
 0x2ed   :  { %1968 = vmatprep.subr.bf16.mxu1 %v2294_v52 }
 0x2f0   :  { %1969 = vmatpush3.bf16.msra.mxu1 %v2295_v53 }
 0x2f1   :  { %1970 = vmatprep.subr.bf16.mxu1 %v2296_v54 }
 0x2f4   :  { %1971 = vmatpush3.bf16.msra.mxu1 %v2297_v55 }
 0x2f5   :  { %1972 = vmatprep.subr.bf16.mxu1 %v2298_v56 }
 0x2f8   :  { %1973 = vmatpush3.bf16.msra.mxu1 %v2299_v57 }
 0x3ae   :  { %v1514_v61 = vpop.f32.mrb[8].mxu1 }
 0x3af   :  { %v1515_v62 = vadd.f32 %v1514_v61, %v1313_v59  ;;  %v1516_v63 = vpop.f32.mrb[9].mxu1 }
 0x3b0   :  { %v1517_v0 = vadd.f32 %v1516_v63, %v1317_v60  ;;  %v1518_v1 = vpop.f32.mrb[10].mxu1 }
 0x3b1   :  { %v1519_v2 = vadd.f32 %v1518_v1, %v1313_v59  ;;  %v1520_v3 = vpop.f32.mrb[11].mxu1  ;;  %v1523_v5 = vmax.f32 %v1515_v62, 0.0 }
 0x3b2   :  { %v1521_v4 = vadd.f32 %v1520_v3, %v1317_v60  ;;  %v1524_v7 = vmax.f32 %v1517_v0, 0.0 }
 0x3b3   :  { %v1525_v6 = vmax.f32 %v1519_v2, 0.0 }
 0x3b4   :  { %v1526_v8 = vmax.f32 %v1521_v4, 0.0 }
 0x3b5   :  { %v1527_v9 = vpack.c.bf16 %v1525_v6, %v1523_v5 }
 0x3b6   :  { %v1528_v10 = vpack.c.bf16 %v1526_v8, %v1524_v7 }
 0x3b8   :  { %1696 = vmatprep.mubr.bf16.mxu1 %v1528_v10 }
 0x3b9   :  { %1697 = vmatmul.mubr.bf16.vlgmr.msra.gmra.mrb[12].mxu1 %v1527_v9 }
 0x48c   :  { %v1974_v11 = vpop.f32.mrb[12].mxu1 }
 0x48d   :  { %v1975_v31 = vpop.f32.mrb[13].mxu1 }
 0x48e   :  { %v1976_v12 = vadd.f32 %v1975_v31, %v1974_v11  ;;  %v1977_v13 = vpop.f32.mrb[14].mxu1 }
 0x48f   :  { %v1978_v14 = vpop.f32.mrb[15].mxu1 }
 0x490   :  { %v1979_v15 = vadd.f32 %v1978_v14, %v1977_v13  ;;  %v1699_v16 = vadd.f32 %v1976_v12, %v1939_v33 }
 0x492   :  { %v1702_v17 = vadd.f32 %v1979_v15, %v1939_v33  ;;  %v1705_v18 = vmul.f32 %v1699_v16, %v1699_v16 }
 0x494   :  { %1707 = vadd.xlane.f32.xlu0 %v1705_v18  ;;  %v1706_v19 = vmul.f32 %v1702_v17, %v1702_v17 }
 0x498   :  { %1709 = vadd.xlane.f32.xlu0 %v1706_v19 }
 0x499   :  { %2425 = shalt.err (!%p2422_p2)
}
 0x49a   :  { %s2426_s30 = scalar_lea.hbm %s2667_s9, 256 }
 0x49b   :  { %p2427_p3 = scmp.ne.s32.totalorder %s2667_s9, %s2426_s30  ;;  %p2430_p4 = scmp.lt.u32.totalorder %s2426_s30, %s2667_s9 }
 0x49d   :  { %p2432_p5 = pnand %p2430_p4, %p2427_p3 }
 0x49f   :  { %2435 = shalt.err (!%p2432_p5)
}
 0x4a0   :  { %1730 = dma.vmem_to_hbm [thread:$0]  %s1725_s22, 256, %s2667_s9, [#allocation4], %s2469_s23, %s2469_s23, %s2470_s24  }
 0x4a1   :  { %s2481_s12 = smov [#allocation12]  }
 0x4a2   :  { %s1736_s13 = sshll.u32 %s2481_s12, 4  ;;  %s1737_s13 = int_to_ptr.vmem [resolvable:$true] %s1736_s13 }
 0x4a3   :  { %s2436_s15 = scalar_lea.vmem %s1737_s13, 256  ;;  %p2441_p7 = scmp.lt.s32.totalorder %s1737_s13, %s1737_s13 }
 0x4a4   :  { %p2437_p6 = scmp.ne.s32.totalorder %s1737_s13, %s2436_s15  ;;  %p2442_p8 = scmp.lt.s32.totalorder %s2436_s15, %s2436_s15 }
 0x4a6   :  { %p2443_p9 = por %p2442_p8, %p2441_p7 }
 0x4a8   :  { %p2444_p10 = pnand %p2443_p9, %p2437_p6 }
 0x521   :  { %v1708_v20 = vpop.xlane.xlu0 %1707 }
 0x522   :  { %v1711_v21 = vmax.f32 %v1708_v20, 1e-24 }
 0x524   :  { %2300 = vrsqrt.f32 %v1711_v21 }
 0x525   :  { %v1710_v22 = vpop.xlane.xlu0 %1709 }
 0x526   :  { %v1712_v23 = vmax.f32 %v1710_v22, 1e-24 }
 0x528   :  { %2302 = vrsqrt.f32 %v1712_v23 }
 0x52e   :  { %v2301_v24 = vpop.eup %2300 }
 0x52f   :  { %v1715_v25 = vmul.f32 %v2301_v24, %v1699_v16 }
 0x531   :  { %1717 = vst [vmem:[#allocation12] sm:$0xff] %v1715_v25 }
 0x532   :  { %v2303_v26 = vpop.eup %2302 }
 0x533   :  { %v1716_v27 = vmul.f32 %v2303_v26, %v1702_v17 }
 0x535   :  { %1718 = vst [vmem:[#allocation12 + $0x8] sm:$0xff] %v1716_v27 }
 0x536   :  { %2447 = shalt.err (!%p2444_p10)
}
 0x537   :  { %s2448_s16 = scalar_lea.hbm %s2668_s10, 256 }
 0x538   :  { %p2449_p11 = scmp.ne.s32.totalorder %s2668_s10, %s2448_s16  ;;  %p2452_p12 = scmp.lt.u32.totalorder %s2448_s16, %s2668_s10 }
 0x53a   :  { %p2454_p13 = pnand %p2452_p12, %p2449_p11 }
 0x53c   :  { %2457 = shalt.err (!%p2454_p13)
}
 0x53d   :  { %1742 = dma.vmem_to_hbm [thread:$0]  %s1737_s13, 256, %s2668_s10, [#allocation13], %s2469_s23, %s2469_s23, %s2470_s24  }
 0x53e   :  { %2464 = dma.done.wait [#allocation4], 256  }
 0x53f   :  { %2465 = vsyncadd [#allocation4], 4294967040 }
 0x540   :  { %2466 = dma.done.wait [#allocation13], 256  }
 0x541   :  { %2467 = vsyncadd [#allocation13], 4294967040 }
 0x542   :  { %1749 = vsyncpa [#allocation3], 1 }
 0x543   :  { %1750 = vsyncpa [#allocation6], 1 }
 0x544   :  { %1751 = vsyncpa [#allocation9], 1 }
 0x545   :  { %1752 = vsyncpa [#allocation4], 1 }
 0x546   :  { %1753 = vsyncpa [#allocation13], 1 }

</bundles_post_ra>
